<compile_context>
chip_gen: v6e
topology: v6e:2x2x1
jax: 0.10.0
libtpu: 0.0.40
codegen_flags: <defaults>
</compile_context>

<pallas_src>
import jax
import jax.numpy as jnp
from jax.experimental import pallas as pl
from jax.experimental.pallas import tpu as pltpu


# ----------------------------- Pallas kernel ------------------------------ #
def _make_conv3x3_relu_kernel(B, H, CP):
    """Kernel with all shape constants baked in (static, aligned slices)."""

    def kernel(xp_ref, w_ref, b_ref, out_ref, lhs_ref):
        # xp_ref : (B, H+2, CP)      zero-padded NHWC input rows, lane-padded
        # w_ref  : (3*CP, W*Cout)    kw-merged (shifted block-diagonal) weights
        # b_ref  : (1, W*Cout)       bias tiled across spatial W (lane-dense)
        # out_ref: (B*H, W*Cout)     lane-dense output slab (reshape of NHWC)
        # lhs_ref: (B*H, 3*CP)       VMEM scratch: height-only im2col LHS
        #
        # Build the im2col LHS with fully lane/sublane-aligned stores
        # (lane offsets are multiples of 128, row offsets multiples of 16).
        for b in range(B):                       # tiny static unroll (B=2)
            xb = xp_ref[b]                       # (H+2, CP)
            for kh in range(3):
                lhs_ref[b * H:(b + 1) * H, kh * CP:(kh + 1) * CP] = \
                    xb[kh:kh + H, :]
        # Single MXU call for the whole problem, f32 accumulation.
        acc = jnp.dot(lhs_ref[...], w_ref[...],
                      preferred_element_type=jnp.float32)
        # Bias + ReLU epilogue in f32 (broadcast built once, no per-batch add).
        out_ref[...] = jnp.maximum(acc + b_ref[...], 0.0).astype(out_ref.dtype)

    return kernel


# ------------------ one-time parameter preparation (load time) ------------- #
def prepare_conv_params(w_hwio, bias, *, W, compute_dtype=jnp.bfloat16):
    """Expand (3,3,Cin,Cout) weights into the kw-merged matmul weight.

    Done ONCE outside the jitted hot path (weights are static at inference).
    Returns:
      wall     : (3*CP, W*Cout)  with CP = (W+2)*Cin rounded up to 128 lanes
      bias_row : (1, W*Cout)     f32
    where wall[kh*CP + win*Cin + ci, x*Cout + co] = w[kh, win-x, ci, co]
    if 0 <= win-x <= 2, else 0 (the 3 kw taps live on distinct shifted
    diagonals, so they coexist in one matrix).
    """
    _, _, Cin, Cout = w_hwio.shape
    Wc = (W + 2) * Cin
    CP = ((Wc + 127) // 128) * 128

    win = jnp.arange(W + 2)
    xo = jnp.arange(W)
    kw_idx = win[:, None] - xo[None, :]                    # (W+2, W)
    valid = (kw_idx >= 0) & (kw_idx < 3)
    kw_safe = jnp.clip(kw_idx, 0, 2)
    sel = w_hwio[:, kw_safe, :, :]                         # (3, W+2, W, Cin, Cout)
    sel = sel * valid[None, :, :, None, None].astype(w_hwio.dtype)
    wm = jnp.transpose(sel, (0, 1, 3, 2, 4)).reshape(3, Wc, W * Cout)
    wm = jnp.pad(wm, ((0, 0), (0, CP - Wc), (0, 0)))       # zero rows for lane pad
    wall = wm.reshape(3 * CP, W * Cout).astype(compute_dtype)

    bias_row = jnp.tile(bias, W).reshape(1, W * Cout).astype(jnp.float32)
    return wall, bias_row


# ----------------------------- NHWC pipeline ------------------------------- #
def conv3x3_relu_nhwc(x_nhwc, wall, bias_row, *, compute_dtype=jnp.bfloat16):
    """x_nhwc: (B,H,W,Cin); wall/bias_row from prepare_conv_params.

    Returns (B, H, W, Cout) f32.  All heavy work runs in one Pallas call.
    """
    B, H, W, Cin = x_nhwc.shape
    Cout = wall.shape[1] // W
    HP = H + 2
    Wc = (W + 2) * Cin
    CP = wall.shape[0] // 3

    # Zero-pad once ('same' padding), flatten rows, lane-pad to CP, cast bf16.
    xp = jnp.pad(x_nhwc, ((0, 0), (1, 1), (1, 1), (0, 0)))       # (B,HP,W+2,Cin)
    xp = xp.reshape(B, HP, Wc)
    if CP != Wc:
        xp = jnp.pad(xp, ((0, 0), (0, 0), (0, CP - Wc)))
    xp = xp.astype(compute_dtype)

    kernel = _make_conv3x3_relu_kernel(B, H, CP)
    out_bytes = B * H * W * Cout * 4
    cost = pl.CostEstimate(
        flops=2 * (B * H) * (3 * CP) * (W * Cout),
        transcendentals=0,
        bytes_accessed=(xp.size * xp.dtype.itemsize
                        + wall.size * wall.dtype.itemsize
                        + bias_row.size * 4 + out_bytes))

    out2d = pl.pallas_call(
        kernel,
        out_shape=jax.ShapeDtypeStruct((B * H, W * Cout), jnp.float32),
        in_specs=[
            pl.BlockSpec(memory_space=pltpu.MemorySpace.VMEM),   # padded input
            pl.BlockSpec(memory_space=pltpu.MemorySpace.VMEM),   # merged weights
            pl.BlockSpec(memory_space=pltpu.MemorySpace.VMEM),   # bias row
        ],
        out_specs=pl.BlockSpec(memory_space=pltpu.MemorySpace.VMEM),
        scratch_shapes=[pltpu.VMEM((B * H, 3 * CP), compute_dtype)],
        compiler_params=pltpu.CompilerParams(
            vmem_limit_bytes=32 * 1024 * 1024),
        cost_estimate=cost,
    )(xp, wall, bias_row)

    # (B*H, W*Cout) -> (B, H, W, Cout): pure reshape, no transpose.
    return out2d.reshape(B, H, W, Cout)


# ------------------------ PyTorch-facing adapter --------------------------- #
def wrapped_model_forward(x_nchw, wall, bias_row):
    """WrappedModel(module).forward with module = Conv2d(3x3,pad=1)+ReLU.

    NCHW in / NCHW out to match the PyTorch module contract; the layout
    conversion happens exactly once at the model boundary (in a full NHWC
    pipeline these two transposes disappear entirely).
    """
    x_nhwc = jnp.transpose(x_nchw, (0, 2, 3, 1))
    out_nhwc = conv3x3_relu_nhwc(x_nhwc, wall, bias_row)
    return jnp.transpose(out_nhwc, (0, 3, 1, 2))


# --------------------------------- main ------------------------------------ #
if __name__ == "__main__":
    key = jax.random.PRNGKey(0)
    kx, kw, kb = jax.random.split(key, 3)

    B, Cin, H, W, Cout = 2, 4, 16, 16, 8
    x = jax.random.normal(kx, (B, Cin, H, W), dtype=jnp.float32)
    # deterministic parameter init (Kaiming-ish scaling)
    w_hwio = jax.random.normal(kw, (3, 3, Cin, Cout), dtype=jnp.float32) * (
        1.0 / jnp.sqrt(9.0 * Cin))
    bias = jax.random.normal(kb, (Cout,), dtype=jnp.float32) * 0.01

    # Weight expansion happens once, outside the jitted hot path.
    wall, bias_row = prepare_conv_params(w_hwio, bias, W=W)
    wall = jax.block_until_ready(wall)

    fwd = jax.jit(wrapped_model_forward)
    out = fwd(x, wall, bias_row)
    out = jax.block_until_ready(out)

    # Pure-JAX reference (lax conv, f32) to verify kernel semantics.
    ref = jax.lax.conv_general_dilated(
        x, jnp.transpose(w_hwio, (3, 2, 0, 1)),           # OIHW
        window_strides=(1, 1), padding="SAME",
        dimension_numbers=("NCHW", "OIHW", "NCHW"))
    ref = jnp.maximum(ref + bias.reshape(1, Cout, 1, 1), 0.0)

    assert out.shape == (B, Cout, H, W)
    # bf16 operands vs f32 reference -> loosened tolerance.
    assert jnp.allclose(out, ref, atol=5e-2, rtol=5e-2), "mismatch vs reference"
    print("KERNEL_OK")
</pallas_src>

<mosaic_0001>
module attributes {stable_mosaic.version = 11 : i64} {
  func.func @kernel(%arg0: memref<2x18x128xbf16, #tpu.memory_space<vmem>>, %arg1: memref<384x128xbf16, #tpu.memory_space<vmem>>, %arg2: memref<1x128xf32, #tpu.memory_space<vmem>>, %arg3: memref<32x128xf32, #tpu.memory_space<vmem>>, %arg4: memref<32x384xbf16, #tpu.memory_space<vmem>>) attributes {dimension_semantics = [], scalar_prefetch = 0 : i64, scratch_operands = 1 : i64, tpu.core_type = #tpu.core_type<tc>} {
    %c0 = arith.constant 0 : index
    %c0_0 = arith.constant 0 : index
    %c0_1 = arith.constant 0 : index
    %0 = vector.load %arg0[%c0, %c0_0, %c0_1] : memref<2x18x128xbf16, #tpu.memory_space<vmem>>, vector<1x18x128xbf16>
    %1 = vector.shape_cast %0 : vector<1x18x128xbf16> to vector<18x128xbf16>
    %2 = vector.extract_strided_slice %1 {offsets = [0, 0], sizes = [16, 128], strides = [1, 1]} : vector<18x128xbf16> to vector<16x128xbf16>
    %c0_2 = arith.constant 0 : index
    %c0_3 = arith.constant 0 : index
    %3 = vector.load %arg4[%c0_2, %c0_3] : memref<32x384xbf16, #tpu.memory_space<vmem>>, vector<16x128xbf16>
    tpu.vector_store %arg4[%c0_2, %c0_3], %2 {strides = array<i32>} : memref<32x384xbf16, #tpu.memory_space<vmem>>, vector<16x128xbf16>,
    %4 = vector.extract_strided_slice %1 {offsets = [1, 0], sizes = [16, 128], strides = [1, 1]} : vector<18x128xbf16> to vector<16x128xbf16>
    %c0_4 = arith.constant 0 : index
    %c128 = arith.constant 128 : index
    %5 = vector.load %arg4[%c0_4, %c128] : memref<32x384xbf16, #tpu.memory_space<vmem>>, vector<16x128xbf16>
    tpu.vector_store %arg4[%c0_4, %c128], %4 {strides = array<i32>} : memref<32x384xbf16, #tpu.memory_space<vmem>>, vector<16x128xbf16>,
    %6 = vector.extract_strided_slice %1 {offsets = [2, 0], sizes = [16, 128], strides = [1, 1]} : vector<18x128xbf16> to vector<16x128xbf16>
    %c0_5 = arith.constant 0 : index
    %c256 = arith.constant 256 : index
    %7 = vector.load %arg4[%c0_5, %c256] : memref<32x384xbf16, #tpu.memory_space<vmem>>, vector<16x128xbf16>
    tpu.vector_store %arg4[%c0_5, %c256], %6 {strides = array<i32>} : memref<32x384xbf16, #tpu.memory_space<vmem>>, vector<16x128xbf16>,
    %c1 = arith.constant 1 : index
    %c0_6 = arith.constant 0 : index
    %c0_7 = arith.constant 0 : index
    %8 = vector.load %arg0[%c1, %c0_6, %c0_7] : memref<2x18x128xbf16, #tpu.memory_space<vmem>>, vector<1x18x128xbf16>
    %9 = vector.shape_cast %8 : vector<1x18x128xbf16> to vector<18x128xbf16>
    %10 = vector.extract_strided_slice %9 {offsets = [0, 0], sizes = [16, 128], strides = [1, 1]} : vector<18x128xbf16> to vector<16x128xbf16>
    %c16 = arith.constant 16 : index
    %c0_8 = arith.constant 0 : index
    %11 = vector.load %arg4[%c16, %c0_8] : memref<32x384xbf16, #tpu.memory_space<vmem>>, vector<16x128xbf16>
    tpu.vector_store %arg4[%c16, %c0_8], %10 {strides = array<i32>} : memref<32x384xbf16, #tpu.memory_space<vmem>>, vector<16x128xbf16>,
    %12 = vector.extract_strided_slice %9 {offsets = [1, 0], sizes = [16, 128], strides = [1, 1]} : vector<18x128xbf16> to vector<16x128xbf16>
    %c16_9 = arith.constant 16 : index
    %c128_10 = arith.constant 128 : index
    %13 = vector.load %arg4[%c16_9, %c128_10] : memref<32x384xbf16, #tpu.memory_space<vmem>>, vector<16x128xbf16>
    tpu.vector_store %arg4[%c16_9, %c128_10], %12 {strides = array<i32>} : memref<32x384xbf16, #tpu.memory_space<vmem>>, vector<16x128xbf16>,
    %14 = vector.extract_strided_slice %9 {offsets = [2, 0], sizes = [16, 128], strides = [1, 1]} : vector<18x128xbf16> to vector<16x128xbf16>
    %c16_11 = arith.constant 16 : index
    %c256_12 = arith.constant 256 : index
    %15 = vector.load %arg4[%c16_11, %c256_12] : memref<32x384xbf16, #tpu.memory_space<vmem>>, vector<16x128xbf16>
    tpu.vector_store %arg4[%c16_11, %c256_12], %14 {strides = array<i32>} : memref<32x384xbf16, #tpu.memory_space<vmem>>, vector<16x128xbf16>,
    %c0_13 = arith.constant 0 : index
    %c0_14 = arith.constant 0 : index
    %16 = vector.load %arg4[%c0_13, %c0_14] : memref<32x384xbf16, #tpu.memory_space<vmem>>, vector<32x384xbf16>
    %c0_15 = arith.constant 0 : index
    %c0_16 = arith.constant 0 : index
    %17 = vector.load %arg1[%c0_15, %c0_16] : memref<384x128xbf16, #tpu.memory_space<vmem>>, vector<384x128xbf16>
    %cst = arith.constant dense<0.000000e+00> : vector<32x128xf32>
    %18 = tpu.matmul %16, %17, %cst {dimension_numbers = #tpu.dot_dimension_numbers<[1], [0], [0], [1], [0, 0, 1, 1], [], []>} : vector<32x384xbf16>, vector<384x128xbf16>, vector<32x128xf32> -> vector<32x128xf32>
    %c0_17 = arith.constant 0 : index
    %c0_18 = arith.constant 0 : index
    %19 = vector.load %arg2[%c0_17, %c0_18] : memref<1x128xf32, #tpu.memory_space<vmem>>, vector<1x128xf32>
    %20 = vector.broadcast %19 : vector<1x128xf32> to vector<32x128xf32>
    %21 = arith.addf %18, %20 : vector<32x128xf32>
    %cst_19 = arith.constant 0.000000e+00 : f32
    %22 = vector.broadcast %cst_19 : f32 to vector<32x128xf32>
    %23 = arith.maximumf %21, %22 : vector<32x128xf32>
    %c0_20 = arith.constant 0 : index
    %c0_21 = arith.constant 0 : index
    %24 = vector.load %arg3[%c0_20, %c0_21] : memref<32x128xf32, #tpu.memory_space<vmem>>, vector<32x128xf32>
    tpu.vector_store %arg3[%c0_20, %c0_21], %23 {strides = array<i32>} : memref<32x128xf32, #tpu.memory_space<vmem>>, vector<32x128xf32>,
    return
  }
}

</mosaic_0001>

<bundles_post_ra>
// kernel: wrapped_model_forward.1
= control target key start
LH: loop header
LB: loop body
LE: loop exit
PB: predicated region body
PF: predicated region fallthrough
CT: control target
= control target key end

     0   :  { %vm20_vm0 = vsmask.f32 3328  ;;  %vm21_vm1 = vsmask.f32 7440  ;;  %vm54_vm2 = vcmask 1042432   ;;  %vm55_vm3 = vcmask 1046532   ;;  %s744_s1 = inlined_call_operand.vmem [shape: bf16[384,128], index: 1, kind: input, shape index: {}]   ;;  %s745_s0 = inlined_call_operand.vmem [shape: bf16[2,18,128], index: 0, kind: input, shape index: {}]   ;;  %s746_s2 = inlined_call_operand.vmem [shape: f32[1,128], index: 2, kind: input, shape index: {}]   ;;  %s747_s3 = inlined_call_operand.vmem [shape: f32[32,128], index: 3, kind: output, shape index: {}]  }
   0x1   :  { %v559_v0 = vld [vmem:[%s744_s1 + $0x78] sm:$0xff]   ;;  %v561_v2 = vld [vmem:[%s744_s1 + $0x70] sm:$0xff]   ;;  %v564_v5 = vld [vmem:[%s744_s1 + $0x68] sm:$0xff]  }
   0x2   :  { %v560_v1 = vld [vmem:[%s744_s1 + $0x38] sm:$0xff]   ;;  %501 = vmatprep.subr.bf16.mxu0 %v559_v0  ;;  %v563_v4 = vld [vmem:[%s744_s1 + $0x30] sm:$0xff]   ;;  %v566_v7 = vld [vmem:[%s744_s1 + $0x28] sm:$0xff]  }
   0x3   :  { %502 = vmatpush3.bf16.msra.mxu0 %v560_v1  ;;  %v562_v3 = vld [vmem:[%s744_s1 + $0xb8] sm:$0xff]   ;;  %v565_v6 = vld [vmem:[%s744_s1 + $0xb0] sm:$0xff]   ;;  %v567_v8 = vld [vmem:[%s744_s1 + $0x60] sm:$0xff]  }
   0x4   :  { %503 = vmatprep.subr.bf16.mxu0 %v561_v2  ;;  %539 = vmatprep.subr.bf16.mxu1 %v562_v3  ;;  %v568_v9 = vld [vmem:[%s744_s1 + $0xa8] sm:$0xff]   ;;  %v569_v10 = vld [vmem:[%s744_s1 + $0x20] sm:$0xff]   ;;  %v570_v11 = vld [vmem:[%s744_s1 + $0x58] sm:$0xff]  }
   0x5   :  { %540 = vmatpush3.bf16.msra.mxu1 %v562_v3  ;;  %v571_v12 = vld [vmem:[%s744_s1 + $0xa0] sm:$0xff]   ;;  %v572_v13 = vld [vmem:[%s744_s1 + $0x18] sm:$0xff]   ;;  %v573_v15 = vld [vmem:[%s744_s1 + $0x50] sm:$0xff]  }
   0x6   :  { %541 = vmatprep.subr.bf16.mxu1 %v565_v6  ;;  %v574_v14 = vld [vmem:[%s744_s1 + $0x98] sm:$0xff]   ;;  %v575_v16 = vld [vmem:[%s744_s1 + $0x10] sm:$0xff]   ;;  %v576_v18 = vld [vmem:[%s744_s1 + $0x48] sm:$0xff]  }
   0x7   :  { %504 = vmatpush3.bf16.msra.mxu0 %v563_v4  ;;  %v577_v17 = vld [vmem:[%s744_s1 + $0x90] sm:$0xff]   ;;  %v578_v19 = vld [vmem:[%s744_s1 + $0x8] sm:$0xff]   ;;  %v579_v20 = vld [vmem:[%s744_s1 + $0x40] sm:$0xff]  }
   0x8   :  { %505 = vmatprep.subr.bf16.mxu0 %v564_v5  ;;  %v580_v21 = vld [vmem:[%s744_s1 + $0x88] sm:$0xff]   ;;  %v15_v22 = vld [vmem:[%s745_s0] sm:$0xf]  ;;  %v16_v23 = vld [vmem:[%s745_s0 + $0x4] sm:$0xf] }
   0x9   :  { %542 = vmatpush3.bf16.msra.mxu1 %v565_v6  ;;  %v17_v24 = vld [vmem:[%s745_s0 + $0x8] sm:$0x1]  ;;  %18 = vst [vmem:[#allocation2] sm:$0xf] %v15_v22  ;;  %19 = vst [vmem:[#allocation2 + $0xc] sm:$0xf] %v16_v23 }
   0xa   :  { %543 = vmatprep.subr.bf16.mxu1 %v568_v9  ;;  %v24_v25 = vshrl.u32 %v15_v22, 16  ;;  %v27_v26 = vshll.u32 %v15_v22, 16  ;;  %v33_v27 = vshll.u32 %v16_v23, 16  ;;  %v37_v28 = vshrl.u32 %v16_v23, 16  ;;  %v581_v29 = vld [vmem:[%s744_s1] sm:$0xff]   ;;  %vm691_vm4 = vmor %vm54_vm2, %vm55_vm3 }
   0xb   :  { %506 = vmatpush3.bf16.msra.mxu0 %v566_v7  ;;  %v43_v30 = vshll.u32 %v17_v24, 16  ;;  %v465_v32 = vrot.slane %v15_v22, 9  ;;  %v59_v33 = vrot.slane %v16_v23, 5  ;;  %v466_v38 = vld [vmem:[%s745_s0 + $0xc] sm:$0xf]  ;;  %v585_v40 = vld [vmem:[%s744_s1 + $0x80] sm:$0xff]   ;;  %vm711_vm5 = vmor %vm20_vm0, %vm21_vm1 }
   0xc   :  { %507 = vmatprep.subr.bf16.mxu0 %v567_v8  ;;  %v26_v34 = vrot.slane %v24_v25, 4  ;;  %v29_v35 = vrot.slane %v27_v26, 5  ;;  %v35_v36 = vrot.slane %v33_v27, 5  ;;  %v39_v37 = vrot.slane %v37_v28, 4  ;;  %v467_v44 = vld [vmem:[%s745_s0 + $0x10] sm:$0xf] }
   0xd   :  { %544 = vmatpush3.bf16.msra.mxu1 %v568_v9  ;;  %v45_v39 = vrot.slane %v43_v30, 5  ;;  %v60_v41 = vsel %vm691_vm4, %v465_v32, %v59_v33  ;;  %v61_v42 = vrot.slane %v59_v33, 4  ;;  %v62_v43 = vrot.slane %v17_v24, 5  ;;  %72 = vst [vmem:[#allocation2 + $0x18] sm:$0xf] %v466_v38 }
   0xe   :  { %545 = vmatprep.subr.bf16.mxu1 %v571_v12  ;;  %v30_v45 = vor.u32 %v29_v35, %v26_v34  ;;  %v40_v46 = vor.u32 %v39_v37, %v35_v36  ;;  %66 = vst [vmem:[#allocation2 + $0x8] sm:$0xf] %v60_v41  ;;  %v468_v47 = vld [vmem:[%s745_s0 + $0x14] sm:$0x1]  ;;  %v469_v48 = vrot.slane %v466_v38, 9  ;;  %v107_v49 = vrot.slane %v467_v44, 5 }
   0xf   :  { %508 = vmatpush3.bf16.msra.mxu0 %v569_v10  ;;  %73 = vst [vmem:[#allocation2 + $0x24] sm:$0xf] %v467_v44  ;;  %v63_v51 = vsel %vm691_vm4, %v61_v42, %v62_v43  ;;  %v110_v52 = vrot.slane %v468_v47, 5  ;;  %v75_v53 = vshrl.u32 %v466_v38, 16  ;;  %v78_v54 = vshll.u32 %v466_v38, 16 }
  0x10   :  { %509 = vmatprep.subr.bf16.mxu0 %v570_v11  ;;  %v31_v55 = vrot.slane %v30_v45, 4  ;;  %v41_v56 = vrot.slane %v40_v46, 4  ;;  %67 = vst [vmem:[#allocation2 + $0x14] sm:$0xf] %v63_v51  ;;  %v108_v57 = vsel %vm691_vm4, %v469_v48, %v107_v49  ;;  %v109_v58 = vrot.slane %v107_v49, 4 }
  0x11   :  { %546 = vmatpush3.bf16.msra.mxu1 %v571_v12  ;;  %114 = vst [vmem:[#allocation2 + $0x20] sm:$0xf] %v108_v57  ;;  %v77_v59 = vrot.slane %v75_v53, 4  ;;  %v80_v60 = vrot.slane %v78_v54, 5  ;;  %v84_v61 = vshll.u32 %v467_v44, 16  ;;  %v88_v62 = vshrl.u32 %v467_v44, 16 }
  0x12   :  { %547 = vmatprep.subr.bf16.mxu1 %v574_v14  ;;  %v36_v63 = vsel %vm711_vm5, %v31_v55, %v35_v36  ;;  %v46_v0 = vsel %vm711_vm5, %v41_v56, %v45_v39  ;;  %v111_v1 = vsel %vm691_vm4, %v109_v58, %v110_v52  ;;  %v94_v2 = vshll.u32 %v468_v47, 16  ;;  %v470_v22 = vld [vmem:[%s746_s2] ss:$0 sm:$0xff] }
  0x13   :  { %510 = vmatpush3.bf16.msra.mxu0 %v572_v13  ;;  %49 = vst [vmem:[#allocation2 + $0x4] sm:$0xf] %v36_v63  ;;  %50 = vst [vmem:[#allocation2 + $0x10] sm:$0xf] %v46_v0  ;;  %v81_v3 = vor.u32 %v80_v60, %v77_v59  ;;  %v86_v4 = vrot.slane %v84_v61, 5  ;;  %v90_v5 = vrot.slane %v88_v62, 4 }
  0x14   :  { %511 = vmatprep.subr.bf16.mxu0 %v573_v15  ;;  %115 = vst [vmem:[#allocation2 + $0x2c] sm:$0xf] %v111_v1  ;;  %v96_v8 = vrot.slane %v94_v2, 5  ;;  %v582_v13 = vld [vmem:[#allocation2] ss:$12 sps:$4 sm:$0xff]  }
  0x15   :  { %548 = vmatpush3.bf16.msra.mxu1 %v574_v14  ;;  %v82_v6 = vrot.slane %v81_v3, 4  ;;  %v91_v7 = vor.u32 %v90_v5, %v86_v4 }
  0x16   :  { %549 = vmatprep.subr.bf16.mxu1 %v577_v17 }
  0x17   :  { %512 = vmatpush3.bf16.msra.mxu0 %v575_v16  ;;  %v586_v9 = vld [vmem:[#allocation2 + $0x8] ss:$12 sps:$4 sm:$0xff]   ;;  %v87_v10 = vsel %vm711_vm5, %v82_v6, %v86_v4  ;;  %v92_v11 = vrot.slane %v91_v7, 4 }
  0x18   :  { %513 = vmatprep.subr.bf16.mxu0 %v576_v18  ;;  %100 = vst [vmem:[#allocation2 + $0x1c] sm:$0xf] %v87_v10  ;;  %555 = vmatprep.mubr.bf16.mxu1 %v586_v9 }
  0x19   :  { %550 = vmatpush3.bf16.msra.mxu1 %v577_v17  ;;  %v97_v12 = vsel %vm711_vm5, %v92_v11, %v96_v8  ;;  %v590_v17 = vld [vmem:[#allocation2 + $0x18] ss:$12 sps:$4 sm:$0xff]  }
  0x1a   :  { %551 = vmatprep.subr.bf16.mxu1 %v580_v21  ;;  %101 = vst [vmem:[#allocation2 + $0x28] sm:$0xf] %v97_v12  ;;  %v584_v14 = vld [vmem:[#allocation2 + $0x4] ss:$12 sps:$4 sm:$0xff]  }
  0x1b   :  { %514 = vmatpush3.bf16.msra.mxu0 %v578_v19  ;;  %v587_v15 = vld [vmem:[#allocation2 + $0x20] ss:$12 sps:$4 sm:$0xff]   ;;  %387 = vmatprep.mubr.bf16.mxu0 %v584_v14 }
  0x1c   :  { %515 = vmatprep.subr.bf16.mxu0 %v579_v20 }
  0x1d   :  { %552 = vmatpush3.bf16.msra.mxu1 %v580_v21 }
  0x1e   :  { %553 = vmatprep.subr.bf16.mxu1 %v585_v40 }
  0x1f   :  { %516 = vmatpush3.bf16.msra.mxu0 %v581_v29 }
  0x21   :  { %554 = vmatpush3.bf16.msra.mxu1 %v585_v40  ;;  %v588_v16 = vld [vmem:[#allocation2 + $0x1c] ss:$12 sps:$4 sm:$0xff]  }
  0x22   :  { %388 = vmatmul.mubr.bf16.vlgmr.msra.gmra.mxu0 %v582_v13 }
  0x23   :  { %395 = vmatprep.mubr.bf16.mxu0 %v588_v16 }
  0x24   :  { %556 = vmatmul.mubr.bf16.vlgmr.msra.gmra.mxu1 %v587_v15 }
  0x2a   :  { %396 = vmatmul.mubr.bf16.gmra.mxu0 %v590_v17 }
  0xe2   :  { %v517_v19 = vpop.f32.mrf.mxu0 }
  0xe4   :  { %v557_v18 = vpop.f32.mrf.mxu1  ;;  %v518_v21 = vpop.f32.mrf.mxu0 }
  0xe5   :  { %v519_v23 = vadd.f32 %v518_v21, %v517_v19 }
  0xe6   :  { %v438_v20 = vpop.f32.mrf.mxu1  ;;  %v520_v24 = vpop.f32.mrf.mxu0 }
  0xe7   :  { %v390_v26 = vadd.f32 %v519_v23, %v470_v22 }
  0xe8   :  { %v558_v25 = vpop.f32.mrf.mxu1  ;;  %v521_v27 = vpop.f32.mrf.mxu0 }
  0xe9   :  { %v522_v28 = vadd.f32 %v521_v27, %v520_v24  ;;  %v439_v29 = vadd.f32 %v438_v20, %v390_v26 }
  0xea   :  { %v523_v30 = vpop.f32.mrf.mxu0  ;;  %v441_v31 = vpop.f32.mrf.mxu1 }
  0xeb   :  { %v453_v32 = vmax.f32 %v439_v29, 0.0  ;;  %v393_v33 = vadd.f32 %v522_v28, %v470_v22 }
  0xec   :  { %v524_v34 = vpop.f32.mrf.mxu0 }
  0xed   :  { %457 = vst [vmem:[%s747_s3] sm:$0xff] %v453_v32  ;;  %v525_v35 = vadd.f32 %v524_v34, %v523_v30  ;;  %v442_v36 = vadd.f32 %v441_v31, %v393_v33 }
  0xee   :  { %v526_v37 = vpop.f32.mrf.mxu0 }
  0xef   :  { %v398_v38 = vadd.f32 %v525_v35, %v470_v22  ;;  %v454_v39 = vmax.f32 %v442_v36, 0.0 }
  0xf0   :  { %v527_v40 = vpop.f32.mrf.mxu0 }
  0xf1   :  { %v447_v41 = vadd.f32 %v557_v18, %v398_v38  ;;  %458 = vst [vmem:[%s747_s3 + $0x8] sm:$0xff] %v454_v39  ;;  %v528_v42 = vadd.f32 %v527_v40, %v526_v37 }
  0xf3   :  { %v455_v43 = vmax.f32 %v447_v41, 0.0  ;;  %v401_v44 = vadd.f32 %v528_v42, %v470_v22 }
  0xf5   :  { %459 = vst [vmem:[%s747_s3 + $0x10] sm:$0xff] %v455_v43  ;;  %v450_v45 = vadd.f32 %v558_v25, %v401_v44 }
  0xf7   :  { %v456_v46 = vmax.f32 %v450_v45, 0.0 }
  0xf9   :  { %460 = vst [vmem:[%s747_s3 + $0x18] sm:$0xff] %v456_v46 }

</bundles_post_ra>
